<compile_context>
chip_gen: v5e
topology: v5e:2x2
jax: 0.10.0
libtpu: 0.0.40
codegen_flags: <defaults>
</compile_context>

<pallas_src>
import jax
import jax.numpy as jnp
from jax.experimental import pallas as pl
from jax.experimental.pallas import tpu as pltpu


def biocnn_kernel(x_ref, w1_ref, b1_ref, w2_ref, b2_ref, w3_ref, b3_ref, out_ref):
    # x_ref:  (TB, 36)     flattened 6x6 single-channel input (row = ih*6+iw)
    # w1_ref: (36, 512)    conv1 as dense matmul, b1_ref: (1, 512)
    # w2_ref: (512, 256)   conv2 as dense matmul (torch-flatten col order), b2_ref: (1, 256)
    # w3_ref: (256, 128)   hidden1, N padded 18 -> 128, b3_ref: (1, 128)
    # out_ref: (TB, 128)
    h1 = jnp.dot(x_ref[...], w1_ref[...], preferred_element_type=jnp.float32)
    h1 = jnp.maximum(h1 + b1_ref[...], 0.0)                    # conv1 + ReLU  -> (TB, 512)
    h2 = jnp.dot(h1, w2_ref[...], preferred_element_type=jnp.float32)
    h2 = jnp.maximum(h2 + b2_ref[...], 0.0)                    # conv2 + ReLU  -> (TB, 256)
    y = jnp.dot(h2, w3_ref[...], preferred_element_type=jnp.float32)
    out_ref[...] = jnp.maximum(y + b3_ref[...], 0.0)           # hidden1 + ReLU -> (TB, 128)


def _pack_weights(params):
    """Host-side (trace-time) weight repacking; pure layout, no per-sample compute."""
    W1, B1, W2, B2, W3, B3 = params
    f32 = jnp.float32

    # conv1 (32,1,3,3) -> dense (36, 512); output col = (oh*4+ow)*32 + co
    W1_hw = jnp.transpose(W1[:, 0], (1, 2, 0)).astype(f32)              # (3,3,32) [kh,kw,co]
    cols1 = []
    for oh in range(4):
        for ow in range(4):
            k = jnp.zeros((6, 6, 32), f32).at[oh:oh + 3, ow:ow + 3, :].set(W1_hw)
            cols1.append(k.reshape(36, 32))
    w1 = jnp.concatenate(cols1, axis=1)                                 # (36, 512)
    b1 = jnp.broadcast_to(B1[None, :].astype(f32), (16, 32)).reshape(1, 512)

    # conv2 (64,32,3,3) -> dense (512, 256); row = (oh*4+ow)*32 + ci,
    # output col = co*4 + (oh2*2+ow2)  == torch NCHW flatten order of (64,2,2).
    W2_hw = jnp.transpose(W2, (2, 3, 1, 0)).astype(f32)                 # (3,3,32,64) [kh,kw,ci,co]
    cols2 = []
    for oh2 in range(2):
        for ow2 in range(2):
            k = jnp.zeros((4, 4, 32, 64), f32).at[oh2:oh2 + 3, ow2:ow2 + 3].set(W2_hw)
            cols2.append(k.reshape(512, 64))
    w2 = jnp.stack(cols2, axis=-1).reshape(512, 256)                    # (512, 256)
    b2 = jnp.broadcast_to(B2[:, None].astype(f32), (64, 4)).reshape(1, 256)

    # hidden1 (18, 256); torch flat index c*4+s matches h2 column order exactly.
    # Pad N: 18 -> 128 for an unmasked lane-dense output store.
    w3 = jnp.zeros((256, 128), f32).at[:, :18].set(W3.T.astype(f32))
    b3 = jnp.zeros((1, 128), f32).at[:, :18].set(B3.astype(f32)[None, :])
    return w1, b1, w2, b2, w3, b3


@jax.jit
def biocnn_forward(x_nchw, params):
    Bn = x_nchw.shape[0]
    w1, b1, w2, b2, w3, b3 = _pack_weights(params)

    # Batch tiling: sublane-aligned (multiple of 8), capped at 512 rows/step so
    # (x tile + intermediates + out tile) * double-buffering stays far under the
    # 32 MiB scoped VMEM on every generation (incl. v7x's 64 MiB physical).
    TB = min(512, ((Bn + 7) // 8) * 8)
    B_pad = ((Bn + TB - 1) // TB) * TB
    x_flat = jnp.zeros((B_pad, 36), jnp.float32).at[:Bn].set(
        x_nchw.reshape(Bn, 36).astype(jnp.float32))

    grid = (B_pad // TB,)
    flops = 2 * B_pad * (36 * 512 + 512 * 256 + 256 * 128)
    bytes_accessed = 4 * (B_pad * (36 + 128)
                          + 36 * 512 + 512 + 512 * 256 + 256 + 256 * 128 + 128)

    out = pl.pallas_call(
        biocnn_kernel,
        out_shape=jax.ShapeDtypeStruct((B_pad, 128), jnp.float32),
        grid=grid,
        in_specs=[
            pl.BlockSpec((TB, 36), lambda i: (i, 0)),       # x: tiled over batch
            pl.BlockSpec((36, 512), lambda i: (0, 0)),      # weights: VMEM-resident
            pl.BlockSpec((1, 512), lambda i: (0, 0)),
            pl.BlockSpec((512, 256), lambda i: (0, 0)),
            pl.BlockSpec((1, 256), lambda i: (0, 0)),
            pl.BlockSpec((256, 128), lambda i: (0, 0)),
            pl.BlockSpec((1, 128), lambda i: (0, 0)),
        ],
        out_specs=pl.BlockSpec((TB, 128), lambda i: (i, 0)),
        compiler_params=pltpu.CompilerParams(
            dimension_semantics=("parallel",),
            vmem_limit_bytes=32 * 1024 * 1024,
        ),
        cost_estimate=pl.CostEstimate(
            flops=flops, transcendentals=0, bytes_accessed=bytes_accessed),
    )(x_flat, w1, b1, w2, b2, w3, b3)

    return out[:Bn, :18]


def biocnn_reference(x_nchw, params):
    W1, B1, W2, B2, W3, B3 = params
    y = jax.lax.conv_general_dilated(x_nchw, W1, (1, 1), "VALID",
                                     dimension_numbers=("NCHW", "OIHW", "NCHW"))
    y = jnp.maximum(y + B1[None, :, None, None], 0.0)
    y = jax.lax.conv_general_dilated(y, W2, (1, 1), "VALID",
                                     dimension_numbers=("NCHW", "OIHW", "NCHW"))
    y = jnp.maximum(y + B2[None, :, None, None], 0.0)
    y = y.reshape(y.shape[0], -1)
    y = jnp.maximum(y @ W3.T + B3, 0.0)
    return y


def init_params(key):
    ks = jax.random.split(key, 6)

    def u(k, shape, fan_in):
        bound = 1.0 / (fan_in ** 0.5)
        return jax.random.uniform(k, shape, jnp.float32, -bound, bound)

    W1 = u(ks[0], (32, 1, 3, 3), 1 * 9)     # conv1
    B1 = u(ks[1], (32,), 1 * 9)
    W2 = u(ks[2], (64, 32, 3, 3), 32 * 9)   # conv2
    B2 = u(ks[3], (64,), 32 * 9)
    W3 = u(ks[4], (18, 256), 256)           # hidden1
    B3 = u(ks[5], (18,), 256)
    return (W1, B1, W2, B2, W3, B3)


if __name__ == "__main__":
    key = jax.random.PRNGKey(0)
    kx, kp = jax.random.split(key)
    # Input spatial must be 6x6 so that 64 * 2 * 2 == 256 matches hidden1's fan-in.
    x = jax.random.normal(kx, (2, 1, 6, 6), dtype=jnp.float32)
    params = init_params(kp)

    out = jax.block_until_ready(biocnn_forward(x, params))
    ref = jax.block_until_ready(biocnn_reference(x, params))

    assert out.shape == (2, 18), out.shape
    assert jnp.allclose(out, ref, atol=1e-4, rtol=1e-4), float(jnp.max(jnp.abs(out - ref)))
    print("KERNEL_OK")
</pallas_src>

<mosaic_0001>
module attributes {stable_mosaic.version = 11 : i64} {
  func.func @biocnn_kernel(%arg0: i32, %arg1: memref<8x36xf32, #tpu.memory_space<vmem>>, %arg2: memref<36x512xf32, #tpu.memory_space<vmem>>, %arg3: memref<1x512xf32, #tpu.memory_space<vmem>>, %arg4: memref<512x256xf32, #tpu.memory_space<vmem>>, %arg5: memref<1x256xf32, #tpu.memory_space<vmem>>, %arg6: memref<256x128xf32, #tpu.memory_space<vmem>>, %arg7: memref<1x128xf32, #tpu.memory_space<vmem>>, %arg8: memref<8x128xf32, #tpu.memory_space<vmem>>) attributes {dimension_semantics = [#tpu.dimension_semantics<parallel>], iteration_bounds = array<i64: 1>, scalar_prefetch = 0 : i64, scratch_operands = 0 : i64, tpu.core_type = #tpu.core_type<tc>, window_params = [{transform_indices = @transform_0, window_bounds = array<i64: 8, 36>}, {pipeline_mode = #tpu.pipeline_mode<synchronous>, transform_indices = @transform_1, window_bounds = array<i64: 36, 512>}, {pipeline_mode = #tpu.pipeline_mode<synchronous>, transform_indices = @transform_2, window_bounds = array<i64: 1, 512>}, {pipeline_mode = #tpu.pipeline_mode<synchronous>, transform_indices = @transform_3, window_bounds = array<i64: 512, 256>}, {pipeline_mode = #tpu.pipeline_mode<synchronous>, transform_indices = @transform_4, window_bounds = array<i64: 1, 256>}, {pipeline_mode = #tpu.pipeline_mode<synchronous>, transform_indices = @transform_5, window_bounds = array<i64: 256, 128>}, {pipeline_mode = #tpu.pipeline_mode<synchronous>, transform_indices = @transform_6, window_bounds = array<i64: 1, 128>}, {transform_indices = @transform_7, window_bounds = array<i64: 8, 128>}]} {
    %c0 = arith.constant 0 : index
    %c0_0 = arith.constant 0 : index
    %0 = vector.load %arg1[%c0, %c0_0] : memref<8x36xf32, #tpu.memory_space<vmem>>, vector<8x36xf32>
    %c0_1 = arith.constant 0 : index
    %c0_2 = arith.constant 0 : index
    %1 = vector.load %arg2[%c0_1, %c0_2] : memref<36x512xf32, #tpu.memory_space<vmem>>, vector<36x512xf32>
    %cst = arith.constant dense<0.000000e+00> : vector<8x512xf32>
    %2 = tpu.matmul %0, %1, %cst {dimension_numbers = #tpu.dot_dimension_numbers<[1], [0], [0], [1], [0, 0, 1, 1], [], []>} : vector<8x36xf32>, vector<36x512xf32>, vector<8x512xf32> -> vector<8x512xf32>
    %c0_3 = arith.constant 0 : index
    %c0_4 = arith.constant 0 : index
    %3 = vector.load %arg3[%c0_3, %c0_4] : memref<1x512xf32, #tpu.memory_space<vmem>>, vector<1x512xf32>
    %4 = vector.broadcast %3 : vector<1x512xf32> to vector<8x512xf32>
    %5 = arith.addf %2, %4 : vector<8x512xf32>
    %cst_5 = arith.constant 0.000000e+00 : f32
    %6 = vector.broadcast %cst_5 : f32 to vector<8x512xf32>
    %7 = arith.maximumf %5, %6 : vector<8x512xf32>
    %c0_6 = arith.constant 0 : index
    %c0_7 = arith.constant 0 : index
    %8 = vector.load %arg4[%c0_6, %c0_7] : memref<512x256xf32, #tpu.memory_space<vmem>>, vector<512x256xf32>
    %cst_8 = arith.constant dense<0.000000e+00> : vector<8x256xf32>
    %9 = tpu.matmul %7, %8, %cst_8 {dimension_numbers = #tpu.dot_dimension_numbers<[1], [0], [0], [1], [0, 0, 1, 1], [], []>} : vector<8x512xf32>, vector<512x256xf32>, vector<8x256xf32> -> vector<8x256xf32>
    %c0_9 = arith.constant 0 : index
    %c0_10 = arith.constant 0 : index
    %10 = vector.load %arg5[%c0_9, %c0_10] : memref<1x256xf32, #tpu.memory_space<vmem>>, vector<1x256xf32>
    %11 = vector.broadcast %10 : vector<1x256xf32> to vector<8x256xf32>
    %12 = arith.addf %9, %11 : vector<8x256xf32>
    %cst_11 = arith.constant 0.000000e+00 : f32
    %13 = vector.broadcast %cst_11 : f32 to vector<8x256xf32>
    %14 = arith.maximumf %12, %13 : vector<8x256xf32>
    %c0_12 = arith.constant 0 : index
    %c0_13 = arith.constant 0 : index
    %15 = vector.load %arg6[%c0_12, %c0_13] : memref<256x128xf32, #tpu.memory_space<vmem>>, vector<256x128xf32>
    %cst_14 = arith.constant dense<0.000000e+00> : vector<8x128xf32>
    %16 = tpu.matmul %14, %15, %cst_14 {dimension_numbers = #tpu.dot_dimension_numbers<[1], [0], [0], [1], [0, 0, 1, 1], [], []>} : vector<8x256xf32>, vector<256x128xf32>, vector<8x128xf32> -> vector<8x128xf32>
    %c0_15 = arith.constant 0 : index
    %c0_16 = arith.constant 0 : index
    %17 = vector.load %arg7[%c0_15, %c0_16] : memref<1x128xf32, #tpu.memory_space<vmem>>, vector<1x128xf32>
    %18 = vector.broadcast %17 : vector<1x128xf32> to vector<8x128xf32>
    %19 = arith.addf %16, %18 : vector<8x128xf32>
    %cst_17 = arith.constant 0.000000e+00 : f32
    %20 = vector.broadcast %cst_17 : f32 to vector<8x128xf32>
    %21 = arith.maximumf %19, %20 : vector<8x128xf32>
    %c0_18 = arith.constant 0 : index
    %c0_19 = arith.constant 0 : index
    %22 = vector.load %arg8[%c0_18, %c0_19] : memref<8x128xf32, #tpu.memory_space<vmem>>, vector<8x128xf32>
    tpu.vector_store %arg8[%c0_18, %c0_19], %21 {strides = array<i32>} : memref<8x128xf32, #tpu.memory_space<vmem>>, vector<8x128xf32>,
    return
  }
  func.func @transform_0(%arg0: i32) -> (i32, i32) {
    %c0_i32 = arith.constant 0 : i32
    %c0_i32_0 = arith.constant 0 : i32
    return %arg0, %c0_i32 : i32, i32
  }
  func.func @transform_1(%arg0: i32) -> (i32, i32) {
    %c0_i32 = arith.constant 0 : i32
    %c0_i32_0 = arith.constant 0 : i32
    %c0_i32_1 = arith.constant 0 : i32
    return %c0_i32, %c0_i32_0 : i32, i32
  }
  func.func @transform_2(%arg0: i32) -> (i32, i32) {
    %c0_i32 = arith.constant 0 : i32
    %c0_i32_0 = arith.constant 0 : i32
    %c0_i32_1 = arith.constant 0 : i32
    return %c0_i32, %c0_i32_0 : i32, i32
  }
  func.func @transform_3(%arg0: i32) -> (i32, i32) {
    %c0_i32 = arith.constant 0 : i32
    %c0_i32_0 = arith.constant 0 : i32
    %c0_i32_1 = arith.constant 0 : i32
    return %c0_i32, %c0_i32_0 : i32, i32
  }
  func.func @transform_4(%arg0: i32) -> (i32, i32) {
    %c0_i32 = arith.constant 0 : i32
    %c0_i32_0 = arith.constant 0 : i32
    %c0_i32_1 = arith.constant 0 : i32
    return %c0_i32, %c0_i32_0 : i32, i32
  }
  func.func @transform_5(%arg0: i32) -> (i32, i32) {
    %c0_i32 = arith.constant 0 : i32
    %c0_i32_0 = arith.constant 0 : i32
    %c0_i32_1 = arith.constant 0 : i32
    return %c0_i32, %c0_i32_0 : i32, i32
  }
  func.func @transform_6(%arg0: i32) -> (i32, i32) {
    %c0_i32 = arith.constant 0 : i32
    %c0_i32_0 = arith.constant 0 : i32
    %c0_i32_1 = arith.constant 0 : i32
    return %c0_i32, %c0_i32_0 : i32, i32
  }
  func.func @transform_7(%arg0: i32) -> (i32, i32) {
    %c0_i32 = arith.constant 0 : i32
    %c0_i32_0 = arith.constant 0 : i32
    return %arg0, %c0_i32 : i32, i32
  }
}

</mosaic_0001>

<bundles_post_ra>
// kernel: biocnn_forward.1
= control target key start
LH: loop header
LB: loop body
LE: loop exit
PB: predicated region body
PF: predicated region fallthrough
CT: control target
= control target key end

     0   :  { %vm61_vm0 = vcmask 1043456   ;;  %vm57_vm1 = vcmask 293888   ;;  %s1148_s1 = inlined_call_operand.vmem [shape: f32[36,512], index: 1, kind: input, shape index: {}]   ;;  %s1149_s0 = inlined_call_operand.vmem [shape: f32[8,36], index: 0, kind: input, shape index: {}]   ;;  %s1150_s3 = inlined_call_operand.vmem [shape: f32[512,256], index: 3, kind: input, shape index: {}]   ;;  %s1151_s2 = inlined_call_operand.vmem [shape: f32[1,512], index: 2, kind: input, shape index: {}]   ;;  %s1152_s5 = inlined_call_operand.vmem [shape: f32[256,128], index: 5, kind: input, shape index: {}]   ;;  %s1153_s6 = inlined_call_operand.vmem [shape: f32[1,128], index: 6, kind: input, shape index: {}]   ;;  %s1154_s4 = inlined_call_operand.vmem [shape: f32[1,256], index: 4, kind: input, shape index: {}]   ;;  %s1155_s7 = inlined_call_operand.vmem [shape: f32[8,128], index: 7, kind: output, shape index: {}]  }
   0x1   :  { %v43_v0 = vld [vmem:[%s1148_s1 + $0x80] sm:$0xf]  ;;  %v44_v1 = vld [vmem:[%s1148_s1 + $0x88] sm:$0xf]  ;;  %v188_v11 = vld [vmem:[%s1150_s3 + $0xf0] sm:$0xff] }
   0x2   :  { %v39_v2 = vld [vmem:[%s1148_s1 + $0x60] sm:$0xff]  ;;  %536 = vmatpush.msk.msra.mxu2 %vm61_vm0, %v43_v0  ;;  %538 = vmatpush.msk.msra.mxu3 %vm61_vm0, %v44_v1  ;;  %v40_v3 = vld [vmem:[%s1148_s1 + $0x68] sm:$0xff]  ;;  %v220_v12 = vld [vmem:[%s1150_s3 + $0x1f0] sm:$0xff] }
   0x3   :  { %v35_v4 = vld [vmem:[%s1148_s1 + $0x40] sm:$0xff]  ;;  %v36_v5 = vld [vmem:[%s1148_s1 + $0x48] sm:$0xff]  ;;  %v45_v13 = vld [vmem:[%s1148_s1 + $0x90] sm:$0xf]  ;;  %292 = vmatpush.msra.mxu0 %v188_v11  ;;  %312 = vmatpush.msra.mxu1 %v220_v12 }
   0x4   :  { %86 = vmatpush.msra.mxu2 %v39_v2  ;;  %106 = vmatpush.msra.mxu3 %v40_v3  ;;  %v31_v6 = vld [vmem:[%s1148_s1 + $0x20] sm:$0xff]  ;;  %v32_v7 = vld [vmem:[%s1148_s1 + $0x28] sm:$0xff]  ;;  %v46_v14 = vld [vmem:[%s1148_s1 + $0x98] sm:$0xf] }
   0x5   :  { %v27_v8 = vld [vmem:[%s1148_s1] sm:$0xff]  ;;  %v28_v9 = vld [vmem:[%s1148_s1 + $0x8] sm:$0xff]  ;;  %v41_v17 = vld [vmem:[%s1148_s1 + $0x70] sm:$0xff] }
   0x6   :  { %87 = vmatpush.msra.mxu2 %v35_v4  ;;  %107 = vmatpush.msra.mxu3 %v36_v5  ;;  %v26_v10 = vld [vmem:[%s1149_s0] sm:$0xff]  ;;  %v42_v18 = vld [vmem:[%s1148_s1 + $0x78] sm:$0xff]  ;;  %v184_v19 = vld [vmem:[%s1150_s3 + $0xd0] sm:$0xff] }
   0x7   :  { %v186_v15 = vld [vmem:[%s1150_s3 + $0xe0] sm:$0xff]  ;;  %v216_v20 = vld [vmem:[%s1150_s3 + $0x1d0] sm:$0xff]  ;;  %v38_v22 = vld [vmem:[%s1148_s1 + $0x58] sm:$0xff] }
   0x8   :  { %88 = vmatpush.msra.mxu2 %v31_v6  ;;  %108 = vmatpush.msra.mxu3 %v32_v7  ;;  %v218_v16 = vld [vmem:[%s1150_s3 + $0x1e0] sm:$0xff]  ;;  %v37_v21 = vld [vmem:[%s1148_s1 + $0x50] sm:$0xff]  ;;  %v34_v26 = vld [vmem:[%s1148_s1 + $0x38] sm:$0xff] }
   0x9   :  { %293 = vmatpush.msra.mxu0 %v186_v15  ;;  %313 = vmatpush.msra.mxu1 %v218_v16  ;;  %v182_v23 = vld [vmem:[%s1150_s3 + $0xc0] sm:$0xff]  ;;  %v33_v25 = vld [vmem:[%s1148_s1 + $0x30] sm:$0xff]  ;;  %v30_v30 = vld [vmem:[%s1148_s1 + $0x18] sm:$0xff] }
   0xa   :  { %89 = vmatpush.msra.mxu2 %v27_v8  ;;  %109 = vmatpush.msra.mxu3 %v28_v9  ;;  %v214_v24 = vld [vmem:[%s1150_s3 + $0x1c0] sm:$0xff]  ;;  %v180_v27 = vld [vmem:[%s1150_s3 + $0xb0] sm:$0xff] }
   0xb   :  { %537 = vmatmul.msk.f32.vlgmr.msra.gmra.mxu2 %vm57_vm1, %v26_v10  ;;  %539 = vmatmul.msk.f32.vlgmr.msra.gmra.mxu3 %vm57_vm1, %v26_v10  ;;  %v212_v28 = vld [vmem:[%s1150_s3 + $0x1b0] sm:$0xff]  ;;  %v178_v33 = vld [vmem:[%s1150_s3 + $0xa0] sm:$0xff] }
   0xc   :  { %540 = vmatpush.msk.msrb.mxu2 %vm61_vm0, %v45_v13  ;;  %542 = vmatpush.msk.msrb.mxu3 %vm61_vm0, %v46_v14  ;;  %v29_v29 = vld [vmem:[%s1148_s1 + $0x10] sm:$0xff]  ;;  %v210_v34 = vld [vmem:[%s1150_s3 + $0x1a0] sm:$0xff]  ;;  %v189_v13 = vld [vmem:[%s1150_s3 + $0xf8] sm:$0xff] }
   0xd   :  { %294 = vmatpush.msra.mxu0 %v184_v19  ;;  %314 = vmatpush.msra.mxu1 %v216_v20  ;;  %v252_v31 = vld [vmem:[%s1150_s3 + $0x2f0] sm:$0xff]  ;;  %v250_v35 = vld [vmem:[%s1150_s3 + $0x2e0] sm:$0xff]  ;;  %v221_v14 = vld [vmem:[%s1150_s3 + $0x1f8] sm:$0xff] }
   0xe   :  { %126 = vmatpush.msrb.mxu2 %v41_v17  ;;  %146 = vmatpush.msrb.mxu3 %v42_v18  ;;  %v284_v32 = vld [vmem:[%s1150_s3 + $0x3f0] sm:$0xff]  ;;  %v282_v36 = vld [vmem:[%s1150_s3 + $0x3e0] sm:$0xff]  ;;  %v187_v17 = vld [vmem:[%s1150_s3 + $0xe8] sm:$0xff] }
   0xf   :  { %295 = vmatpush.msra.mxu0 %v182_v23  ;;  %315 = vmatpush.msra.mxu1 %v214_v24  ;;  %v176_v37 = vld [vmem:[%s1150_s3 + $0x90] sm:$0xff]  ;;  %v174_v41 = vld [vmem:[%s1150_s3 + $0x80] sm:$0xff]  ;;  %v219_v18 = vld [vmem:[%s1150_s3 + $0x1e8] sm:$0xff] }
  0x10   :  { %127 = vmatpush.msrb.mxu2 %v37_v21  ;;  %147 = vmatpush.msrb.mxu3 %v38_v22  ;;  %v208_v38 = vld [vmem:[%s1150_s3 + $0x190] sm:$0xff]  ;;  %v206_v42 = vld [vmem:[%s1150_s3 + $0x180] sm:$0xff]  ;;  %v185_v21 = vld [vmem:[%s1150_s3 + $0xd8] sm:$0xff] }
  0x11   :  { %296 = vmatpush.msra.mxu0 %v180_v27  ;;  %316 = vmatpush.msra.mxu1 %v212_v28  ;;  %v248_v39 = vld [vmem:[%s1150_s3 + $0x2d0] sm:$0xff]  ;;  %v246_v43 = vld [vmem:[%s1150_s3 + $0x2c0] sm:$0xff]  ;;  %v217_v22 = vld [vmem:[%s1150_s3 + $0x1d8] sm:$0xff] }
  0x12   :  { %128 = vmatpush.msrb.mxu2 %v33_v25  ;;  %148 = vmatpush.msrb.mxu3 %v34_v26  ;;  %v280_v40 = vld [vmem:[%s1150_s3 + $0x3d0] sm:$0xff]  ;;  %v278_v44 = vld [vmem:[%s1150_s3 + $0x3c0] sm:$0xff]  ;;  %v183_v25 = vld [vmem:[%s1150_s3 + $0xc8] sm:$0xff] }
  0x13   :  { %297 = vmatpush.msra.mxu0 %v178_v33  ;;  %317 = vmatpush.msra.mxu1 %v210_v34  ;;  %v172_v45 = vld [vmem:[%s1150_s3 + $0x70] sm:$0xff]  ;;  %v170_v49 = vld [vmem:[%s1150_s3 + $0x60] sm:$0xff]  ;;  %v215_v26 = vld [vmem:[%s1150_s3 + $0x1c8] sm:$0xff] }
  0x14   :  { %129 = vmatpush.msrb.mxu2 %v29_v29  ;;  %149 = vmatpush.msrb.mxu3 %v30_v30  ;;  %v204_v46 = vld [vmem:[%s1150_s3 + $0x170] sm:$0xff]  ;;  %v202_v50 = vld [vmem:[%s1150_s3 + $0x160] sm:$0xff]  ;;  %v181_v29 = vld [vmem:[%s1150_s3 + $0xb8] sm:$0xff] }
  0x15   :  { %541 = vmatmul.msk.f32.vlgmr.msrb.gmra.mxu2 %vm57_vm1, %v26_v10  ;;  %543 = vmatmul.msk.f32.vlgmr.msrb.gmra.mxu3 %vm57_vm1, %v26_v10  ;;  %v244_v47 = vld [vmem:[%s1150_s3 + $0x2b0] sm:$0xff]  ;;  %v242_v51 = vld [vmem:[%s1150_s3 + $0x2a0] sm:$0xff]  ;;  %v213_v30 = vld [vmem:[%s1150_s3 + $0x1b8] sm:$0xff] }
  0x16   :  { %332 = vmatpush.msra.mxu2 %v252_v31  ;;  %352 = vmatpush.msra.mxu3 %v284_v32  ;;  %v276_v48 = vld [vmem:[%s1150_s3 + $0x3b0] sm:$0xff]  ;;  %v274_v52 = vld [vmem:[%s1150_s3 + $0x3a0] sm:$0xff]  ;;  %v253_v31 = vld [vmem:[%s1150_s3 + $0x2f8] sm:$0xff] }
  0x17   :  { %298 = vmatpush.msra.mxu0 %v176_v37  ;;  %318 = vmatpush.msra.mxu1 %v208_v38  ;;  %v168_v53 = vld [vmem:[%s1150_s3 + $0x50] sm:$0xff]  ;;  %v166_v57 = vld [vmem:[%s1150_s3 + $0x40] sm:$0xff]  ;;  %v285_v32 = vld [vmem:[%s1150_s3 + $0x3f8] sm:$0xff] }
  0x18   :  { %333 = vmatpush.msra.mxu2 %v250_v35  ;;  %353 = vmatpush.msra.mxu3 %v282_v36  ;;  %v200_v54 = vld [vmem:[%s1150_s3 + $0x150] sm:$0xff]  ;;  %v198_v58 = vld [vmem:[%s1150_s3 + $0x140] sm:$0xff]  ;;  %v179_v33 = vld [vmem:[%s1150_s3 + $0xa8] sm:$0xff] }
  0x19   :  { %299 = vmatpush.msra.mxu0 %v174_v41  ;;  %319 = vmatpush.msra.mxu1 %v206_v42  ;;  %v240_v55 = vld [vmem:[%s1150_s3 + $0x290] sm:$0xff]  ;;  %v238_v59 = vld [vmem:[%s1150_s3 + $0x280] sm:$0xff]  ;;  %v211_v34 = vld [vmem:[%s1150_s3 + $0x1a8] sm:$0xff] }
  0x1a   :  { %334 = vmatpush.msra.mxu2 %v248_v39  ;;  %354 = vmatpush.msra.mxu3 %v280_v40  ;;  %v272_v56 = vld [vmem:[%s1150_s3 + $0x390] sm:$0xff]  ;;  %v270_v60 = vld [vmem:[%s1150_s3 + $0x380] sm:$0xff]  ;;  %v251_v35 = vld [vmem:[%s1150_s3 + $0x2e8] sm:$0xff] }
  0x1b   :  { %300 = vmatpush.msra.mxu0 %v172_v45  ;;  %320 = vmatpush.msra.mxu1 %v204_v46  ;;  %v164_v61 = vld [vmem:[%s1150_s3 + $0x30] sm:$0xff]  ;;  %v162_v1 = vld [vmem:[%s1150_s3 + $0x20] sm:$0xff]  ;;  %v283_v36 = vld [vmem:[%s1150_s3 + $0x3e8] sm:$0xff] }
  0x1c   :  { %335 = vmatpush.msra.mxu2 %v246_v43  ;;  %355 = vmatpush.msra.mxu3 %v278_v44  ;;  %v196_v62 = vld [vmem:[%s1150_s3 + $0x130] sm:$0xff]  ;;  %v194_v2 = vld [vmem:[%s1150_s3 + $0x120] sm:$0xff]  ;;  %v177_v37 = vld [vmem:[%s1150_s3 + $0x98] sm:$0xff] }
  0x1d   :  { %301 = vmatpush.msra.mxu0 %v170_v49  ;;  %321 = vmatpush.msra.mxu1 %v202_v50  ;;  %v236_v63 = vld [vmem:[%s1150_s3 + $0x270] sm:$0xff]  ;;  %v234_v3 = vld [vmem:[%s1150_s3 + $0x260] sm:$0xff]  ;;  %v209_v38 = vld [vmem:[%s1150_s3 + $0x198] sm:$0xff] }
  0x1e   :  { %336 = vmatpush.msra.mxu2 %v244_v47  ;;  %356 = vmatpush.msra.mxu3 %v276_v48  ;;  %v268_v0 = vld [vmem:[%s1150_s3 + $0x370] sm:$0xff]  ;;  %v266_v4 = vld [vmem:[%s1150_s3 + $0x360] sm:$0xff]  ;;  %v249_v39 = vld [vmem:[%s1150_s3 + $0x2d8] sm:$0xff] }
  0x1f   :  { %302 = vmatpush.msra.mxu0 %v168_v53  ;;  %322 = vmatpush.msra.mxu1 %v200_v54  ;;  %v160_v5 = vld [vmem:[%s1150_s3 + $0x10] sm:$0xff]  ;;  %v158_v9 = vld [vmem:[%s1150_s3] sm:$0xff]  ;;  %v281_v40 = vld [vmem:[%s1150_s3 + $0x3d8] sm:$0xff] }
  0x20   :  { %337 = vmatpush.msra.mxu2 %v242_v51  ;;  %357 = vmatpush.msra.mxu3 %v274_v52  ;;  %v192_v6 = vld [vmem:[%s1150_s3 + $0x110] sm:$0xff]  ;;  %v190_v10 = vld [vmem:[%s1150_s3 + $0x100] sm:$0xff]  ;;  %v175_v41 = vld [vmem:[%s1150_s3 + $0x88] sm:$0xff] }
  0x21   :  { %303 = vmatpush.msra.mxu0 %v166_v57  ;;  %323 = vmatpush.msra.mxu1 %v198_v58  ;;  %v232_v7 = vld [vmem:[%s1150_s3 + $0x250] sm:$0xff]  ;;  %v230_v11 = vld [vmem:[%s1150_s3 + $0x240] sm:$0xff]  ;;  %v207_v42 = vld [vmem:[%s1150_s3 + $0x188] sm:$0xff] }
  0x22   :  { %338 = vmatpush.msra.mxu2 %v240_v55  ;;  %358 = vmatpush.msra.mxu3 %v272_v56  ;;  %v264_v8 = vld [vmem:[%s1150_s3 + $0x350] sm:$0xff]  ;;  %v262_v12 = vld [vmem:[%s1150_s3 + $0x340] sm:$0xff]  ;;  %v247_v43 = vld [vmem:[%s1150_s3 + $0x2c8] sm:$0xff] }
  0x23   :  { %304 = vmatpush.msra.mxu0 %v164_v61  ;;  %324 = vmatpush.msra.mxu1 %v196_v62  ;;  %v228_v15 = vld [vmem:[%s1150_s3 + $0x230] sm:$0xff]  ;;  %v226_v19 = vld [vmem:[%s1150_s3 + $0x220] sm:$0xff]  ;;  %v279_v44 = vld [vmem:[%s1150_s3 + $0x3c8] sm:$0xff] }
  0x24   :  { %339 = vmatpush.msra.mxu2 %v238_v59  ;;  %359 = vmatpush.msra.mxu3 %v270_v60  ;;  %v260_v16 = vld [vmem:[%s1150_s3 + $0x330] sm:$0xff]  ;;  %v258_v20 = vld [vmem:[%s1150_s3 + $0x320] sm:$0xff]  ;;  %v173_v45 = vld [vmem:[%s1150_s3 + $0x78] sm:$0xff] }
  0x25   :  { %305 = vmatpush.msra.mxu0 %v162_v1  ;;  %325 = vmatpush.msra.mxu1 %v194_v2  ;;  %v224_v23 = vld [vmem:[%s1150_s3 + $0x210] sm:$0xff]  ;;  %v222_v27 = vld [vmem:[%s1150_s3 + $0x200] sm:$0xff]  ;;  %v205_v46 = vld [vmem:[%s1150_s3 + $0x178] sm:$0xff] }
  0x26   :  { %340 = vmatpush.msra.mxu2 %v236_v63  ;;  %360 = vmatpush.msra.mxu3 %v268_v0  ;;  %v256_v24 = vld [vmem:[%s1150_s3 + $0x310] sm:$0xff]  ;;  %v254_v28 = vld [vmem:[%s1150_s3 + $0x300] sm:$0xff]  ;;  %v245_v47 = vld [vmem:[%s1150_s3 + $0x2b8] sm:$0xff] }
  0x27   :  { %306 = vmatpush.msra.mxu0 %v160_v5  ;;  %326 = vmatpush.msra.mxu1 %v192_v6  ;;  %v277_v48 = vld [vmem:[%s1150_s3 + $0x3b8] sm:$0xff]  ;;  %v171_v49 = vld [vmem:[%s1150_s3 + $0x68] sm:$0xff] }
  0x28   :  { %341 = vmatpush.msra.mxu2 %v234_v3  ;;  %361 = vmatpush.msra.mxu3 %v266_v4  ;;  %v203_v50 = vld [vmem:[%s1150_s3 + $0x168] sm:$0xff]  ;;  %v169_v53 = vld [vmem:[%s1150_s3 + $0x58] sm:$0xff] }
  0x29   :  { %307 = vmatpush.msra.mxu0 %v158_v9  ;;  %327 = vmatpush.msra.mxu1 %v190_v10  ;;  %v243_v51 = vld [vmem:[%s1150_s3 + $0x2a8] sm:$0xff]  ;;  %v201_v54 = vld [vmem:[%s1150_s3 + $0x158] sm:$0xff] }
  0x2a   :  { %342 = vmatpush.msra.mxu2 %v232_v7  ;;  %362 = vmatpush.msra.mxu3 %v264_v8  ;;  %v275_v52 = vld [vmem:[%s1150_s3 + $0x3a8] sm:$0xff]  ;;  %v241_v55 = vld [vmem:[%s1150_s3 + $0x298] sm:$0xff] }
  0x2b   :  { %372 = vmatpush.msrb.mxu0 %v189_v13  ;;  %392 = vmatpush.msrb.mxu1 %v221_v14  ;;  %v273_v56 = vld [vmem:[%s1150_s3 + $0x398] sm:$0xff]  ;;  %v167_v57 = vld [vmem:[%s1150_s3 + $0x48] sm:$0xff] }
  0x2c   :  { %343 = vmatpush.msra.mxu2 %v230_v11  ;;  %363 = vmatpush.msra.mxu3 %v262_v12  ;;  %v199_v58 = vld [vmem:[%s1150_s3 + $0x148] sm:$0xff]  ;;  %v165_v61 = vld [vmem:[%s1150_s3 + $0x38] sm:$0xff] }
  0x2d   :  { %373 = vmatpush.msrb.mxu0 %v187_v17  ;;  %393 = vmatpush.msrb.mxu1 %v219_v18  ;;  %v239_v59 = vld [vmem:[%s1150_s3 + $0x288] sm:$0xff]  ;;  %v197_v62 = vld [vmem:[%s1150_s3 + $0x138] sm:$0xff] }
  0x2e   :  { %344 = vmatpush.msra.mxu2 %v228_v15  ;;  %364 = vmatpush.msra.mxu3 %v260_v16  ;;  %v271_v60 = vld [vmem:[%s1150_s3 + $0x388] sm:$0xff]  ;;  %v237_v63 = vld [vmem:[%s1150_s3 + $0x278] sm:$0xff] }
  0x2f   :  { %374 = vmatpush.msrb.mxu0 %v185_v21  ;;  %394 = vmatpush.msrb.mxu1 %v217_v22  ;;  %v269_v0 = vld [vmem:[%s1150_s3 + $0x378] sm:$0xff]  ;;  %v163_v1 = vld [vmem:[%s1150_s3 + $0x28] sm:$0xff]  ;;  %v47_v21 = vld [vmem:[%s1151_s2] sm:$0xf] }
  0x30   :  { %345 = vmatpush.msra.mxu2 %v226_v19  ;;  %365 = vmatpush.msra.mxu3 %v258_v20  ;;  %v195_v2 = vld [vmem:[%s1150_s3 + $0x128] sm:$0xff]  ;;  %v161_v5 = vld [vmem:[%s1150_s3 + $0x18] sm:$0xff]  ;;  %v49_v22 = vperm.slane %v47_v21, 0 }
  0x31   :  { %375 = vmatpush.msrb.mxu0 %v183_v25  ;;  %395 = vmatpush.msrb.mxu1 %v215_v26  ;;  %v235_v3 = vld [vmem:[%s1150_s3 + $0x268] sm:$0xff]  ;;  %v193_v6 = vld [vmem:[%s1150_s3 + $0x118] sm:$0xff] }
  0x32   :  { %346 = vmatpush.msra.mxu2 %v224_v23  ;;  %366 = vmatpush.msra.mxu3 %v256_v24  ;;  %v267_v4 = vld [vmem:[%s1150_s3 + $0x368] sm:$0xff]  ;;  %v233_v7 = vld [vmem:[%s1150_s3 + $0x258] sm:$0xff]  ;;  %v50_v23 = vperm.slane %v47_v21, 1 }
  0x33   :  { %376 = vmatpush.msrb.mxu0 %v181_v29  ;;  %396 = vmatpush.msrb.mxu1 %v213_v30  ;;  %v265_v8 = vld [vmem:[%s1150_s3 + $0x358] sm:$0xff]  ;;  %v159_v9 = vld [vmem:[%s1150_s3 + $0x8] sm:$0xff] }
  0x34   :  { %347 = vmatpush.msra.mxu2 %v222_v27  ;;  %367 = vmatpush.msra.mxu3 %v254_v28  ;;  %v191_v10 = vld [vmem:[%s1150_s3 + $0x108] sm:$0xff]  ;;  %v229_v13 = vld [vmem:[%s1150_s3 + $0x238] sm:$0xff] }
  0x35   :  { %377 = vmatpush.msrb.mxu0 %v179_v33  ;;  %397 = vmatpush.msrb.mxu1 %v211_v34  ;;  %v231_v11 = vld [vmem:[%s1150_s3 + $0x248] sm:$0xff]  ;;  %v261_v14 = vld [vmem:[%s1150_s3 + $0x338] sm:$0xff]  ;;  %v51_v33 = vperm.slane %v47_v21, 2  ;;  %v52_v34 = vperm.slane %v47_v21, 3 }
  0x36   :  { %412 = vmatpush.msrb.mxu2 %v253_v31  ;;  %432 = vmatpush.msrb.mxu3 %v285_v32  ;;  %v263_v12 = vld [vmem:[%s1150_s3 + $0x348] sm:$0xff]  ;;  %v225_v17 = vld [vmem:[%s1150_s3 + $0x218] sm:$0xff]  ;;  %v468_v32 = vld [vmem:[%s1152_s5 + $0x70] sm:$0xff] }
  0x37   :  { %378 = vmatpush.msrb.mxu0 %v177_v37  ;;  %398 = vmatpush.msrb.mxu1 %v209_v38  ;;  %v227_v15 = vld [vmem:[%s1150_s3 + $0x228] sm:$0xff]  ;;  %v257_v18 = vld [vmem:[%s1150_s3 + $0x318] sm:$0xff] }
  0x38   :  { %413 = vmatpush.msrb.mxu2 %v251_v35  ;;  %433 = vmatpush.msrb.mxu3 %v283_v36  ;;  %v259_v16 = vld [vmem:[%s1150_s3 + $0x328] sm:$0xff]  ;;  %v469_v30 = vld [vmem:[%s1152_s5 + $0x78] sm:$0xff]  ;;  %v466_v36 = vld [vmem:[%s1152_s5 + $0x60] sm:$0xff] }
  0x39   :  { %379 = vmatpush.msrb.mxu0 %v175_v41  ;;  %399 = vmatpush.msrb.mxu1 %v207_v42  ;;  %v223_v19 = vld [vmem:[%s1150_s3 + $0x208] sm:$0xff]  ;;  %v485_v31 = vld [vmem:[%s1152_s5 + $0xf8] sm:$0xff] }
  0x3a   :  { %414 = vmatpush.msrb.mxu2 %v249_v39  ;;  %434 = vmatpush.msrb.mxu3 %v281_v40  ;;  %v255_v20 = vld [vmem:[%s1150_s3 + $0x308] sm:$0xff]  ;;  %v465_v41 = vld [vmem:[%s1152_s5 + $0x58] sm:$0xff] }
  0x3b   :  { %380 = vmatpush.msrb.mxu0 %v173_v45  ;;  %400 = vmatpush.msrb.mxu1 %v205_v46  ;;  %v467_v35 = vld [vmem:[%s1152_s5 + $0x68] sm:$0xff]  ;;  %v484_v45 = vld [vmem:[%s1152_s5 + $0xf0] sm:$0xff] }
  0x3c   :  { %415 = vmatpush.msrb.mxu2 %v247_v43  ;;  %435 = vmatpush.msrb.mxu3 %v279_v44  ;;  %v464_v44 = vld [vmem:[%s1152_s5 + $0x50] sm:$0xff]  ;;  %v463_v46 = vld [vmem:[%s1152_s5 + $0x48] sm:$0xff] }
  0x3d   :  { %381 = vmatpush.msrb.mxu0 %v171_v49  ;;  %401 = vmatpush.msrb.mxu1 %v203_v50  ;;  %v482_v49 = vld [vmem:[%s1152_s5 + $0xe0] sm:$0xff]  ;;  %v461_v50 = vld [vmem:[%s1152_s5 + $0x38] sm:$0xff] }
  0x3e   :  { %416 = vmatpush.msrb.mxu2 %v245_v47  ;;  %436 = vmatpush.msrb.mxu3 %v277_v48  ;;  %v483_v47 = vld [vmem:[%s1152_s5 + $0xe8] sm:$0xff]  ;;  %v462_v48 = vld [vmem:[%s1152_s5 + $0x40] sm:$0xff] }
  0x3f   :  { %382 = vmatpush.msrb.mxu0 %v169_v53  ;;  %402 = vmatpush.msrb.mxu1 %v201_v54  ;;  %v480_v53 = vld [vmem:[%s1152_s5 + $0xd0] sm:$0xff]  ;;  %v459_v54 = vld [vmem:[%s1152_s5 + $0x28] sm:$0xff] }
  0x40   :  { %417 = vmatpush.msrb.mxu2 %v243_v51  ;;  %437 = vmatpush.msrb.mxu3 %v275_v52  ;;  %v481_v51 = vld [vmem:[%s1152_s5 + $0xd8] sm:$0xff]  ;;  %v460_v52 = vld [vmem:[%s1152_s5 + $0x30] sm:$0xff] }
  0x41   :  { %383 = vmatpush.msrb.mxu0 %v167_v57  ;;  %403 = vmatpush.msrb.mxu1 %v199_v58  ;;  %v478_v57 = vld [vmem:[%s1152_s5 + $0xc0] sm:$0xff]  ;;  %v457_v58 = vld [vmem:[%s1152_s5 + $0x18] sm:$0xff] }
  0x42   :  { %418 = vmatpush.msrb.mxu2 %v241_v55  ;;  %438 = vmatpush.msrb.mxu3 %v273_v56  ;;  %v479_v55 = vld [vmem:[%s1152_s5 + $0xc8] sm:$0xff]  ;;  %v458_v56 = vld [vmem:[%s1152_s5 + $0x20] sm:$0xff] }
  0x43   :  { %384 = vmatpush.msrb.mxu0 %v165_v61  ;;  %404 = vmatpush.msrb.mxu1 %v197_v62  ;;  %v476_v61 = vld [vmem:[%s1152_s5 + $0xb0] sm:$0xff]  ;;  %v455_v62 = vld [vmem:[%s1152_s5 + $0x8] sm:$0xff] }
  0x44   :  { %419 = vmatpush.msrb.mxu2 %v239_v59  ;;  %439 = vmatpush.msrb.mxu3 %v271_v60  ;;  %v477_v59 = vld [vmem:[%s1152_s5 + $0xb8] sm:$0xff]  ;;  %v456_v60 = vld [vmem:[%s1152_s5 + $0x10] sm:$0xff] }
  0x45   :  { %385 = vmatpush.msrb.mxu0 %v163_v1  ;;  %405 = vmatpush.msrb.mxu1 %v195_v2  ;;  %v474_v1 = vld [vmem:[%s1152_s5 + $0xa0] sm:$0xff]  ;;  %v473_v2 = vld [vmem:[%s1152_s5 + $0x98] sm:$0xff] }
  0x46   :  { %420 = vmatpush.msrb.mxu2 %v237_v63  ;;  %440 = vmatpush.msrb.mxu3 %v269_v0  ;;  %v475_v63 = vld [vmem:[%s1152_s5 + $0xa8] sm:$0xff]  ;;  %v454_v0 = vld [vmem:[%s1152_s5] sm:$0xff] }
  0x47   :  { %386 = vmatpush.msrb.mxu0 %v161_v5  ;;  %406 = vmatpush.msrb.mxu1 %v193_v6  ;;  %v470_v5 = vld [vmem:[%s1152_s5 + $0x80] sm:$0xff] }
  0x48   :  { %421 = vmatpush.msrb.mxu2 %v235_v3  ;;  %441 = vmatpush.msrb.mxu3 %v267_v4  ;;  %v472_v3 = vld [vmem:[%s1152_s5 + $0x90] sm:$0xff]  ;;  %v471_v4 = vld [vmem:[%s1152_s5 + $0x88] sm:$0xff]  ;;  %v286_v6 = vld [vmem:[%s1154_s4] sm:$0x3] }
  0x49   :  { %387 = vmatpush.msrb.mxu0 %v159_v9  ;;  %407 = vmatpush.msrb.mxu1 %v191_v10 }
  0x4a   :  { %422 = vmatpush.msrb.mxu2 %v233_v7  ;;  %442 = vmatpush.msrb.mxu3 %v265_v8  ;;  %v288_v8 = vperm.slane %v286_v6, 0 }
  0x4c   :  { %423 = vmatpush.msrb.mxu2 %v231_v11  ;;  %443 = vmatpush.msrb.mxu3 %v263_v12  ;;  %v289_v12 = vperm.slane %v286_v6, 1 }
  0x4e   :  { %424 = vmatpush.msrb.mxu2 %v229_v13  ;;  %444 = vmatpush.msrb.mxu3 %v261_v14 }
  0x50   :  { %425 = vmatpush.msrb.mxu2 %v227_v15  ;;  %445 = vmatpush.msrb.mxu3 %v259_v16 }
  0x52   :  { %426 = vmatpush.msrb.mxu2 %v225_v17  ;;  %446 = vmatpush.msrb.mxu3 %v257_v18 }
  0x54   :  { %427 = vmatpush.msrb.mxu2 %v223_v19  ;;  %447 = vmatpush.msrb.mxu3 %v255_v20 }
  0x8e   :  { %v91_v24 = vpop.f32.mrf.mxu2  ;;  %v111_v25 = vpop.f32.mrf.mxu3 }
  0x8f   :  { %v92_v26 = vadd.f32 %v91_v24, %v49_v22  ;;  %v112_v27 = vadd.f32 %v111_v25, %v50_v23 }
  0x91   :  { %v154_v28 = vmax.f32 %v92_v26, 0.0  ;;  %v155_v29 = vmax.f32 %v112_v27, 0.0  ;;  %v544_v27 = vld [vmem:[%s1153_s6] ss:$0 sm:$0xff] }
  0x93   :  { %308 = vmatmul.f32.vlgmr.msra.gmra.mxu0 %v154_v28  ;;  %328 = vmatmul.f32.vlgmr.msra.gmra.mxu1 %v155_v29 }
  0x94   :  { %490 = vmatpush.msra.mxu0 %v469_v30  ;;  %510 = vmatpush.msra.mxu1 %v485_v31 }
  0x96   :  { %491 = vmatpush.msra.mxu0 %v468_v32  ;;  %511 = vmatpush.msra.mxu1 %v484_v45 }
  0x98   :  { %v131_v37 = vpop.f32.mrf.mxu2  ;;  %v151_v38 = vpop.f32.mrf.mxu3  ;;  %492 = vmatpush.msra.mxu0 %v467_v35  ;;  %512 = vmatpush.msra.mxu1 %v483_v47 }
  0x99   :  { %v132_v39 = vadd.f32 %v131_v37, %v51_v33  ;;  %v152_v40 = vadd.f32 %v151_v38, %v52_v34 }
  0x9a   :  { %493 = vmatpush.msra.mxu0 %v466_v36  ;;  %513 = vmatpush.msra.mxu1 %v482_v49 }
  0x9b   :  { %v156_v42 = vmax.f32 %v132_v39, 0.0  ;;  %v157_v43 = vmax.f32 %v152_v40, 0.0  ;;  %388 = vmatmul.f32.vlgmr.msrb.gmra.mxu0 %v154_v28  ;;  %408 = vmatmul.f32.vlgmr.msrb.gmra.mxu1 %v155_v29 }
  0x9c   :  { %494 = vmatpush.msra.mxu0 %v465_v41  ;;  %514 = vmatpush.msra.mxu1 %v481_v51 }
  0x9d   :  { %348 = vmatmul.f32.vlgmr.msra.gmra.mxu2 %v156_v42  ;;  %368 = vmatmul.f32.vlgmr.msra.gmra.mxu3 %v157_v43 }
  0x9e   :  { %495 = vmatpush.msra.mxu0 %v464_v44  ;;  %515 = vmatpush.msra.mxu1 %v480_v53 }
  0xa0   :  { %496 = vmatpush.msra.mxu0 %v463_v46  ;;  %516 = vmatpush.msra.mxu1 %v479_v55 }
  0xa2   :  { %497 = vmatpush.msra.mxu0 %v462_v48  ;;  %517 = vmatpush.msra.mxu1 %v478_v57 }
  0xa4   :  { %498 = vmatpush.msra.mxu0 %v461_v50  ;;  %518 = vmatpush.msra.mxu1 %v477_v59 }
  0xa5   :  { %428 = vmatmul.f32.vlgmr.msrb.gmra.mxu2 %v156_v42  ;;  %448 = vmatmul.f32.vlgmr.msrb.gmra.mxu3 %v157_v43 }
  0xa6   :  { %499 = vmatpush.msra.mxu0 %v460_v52  ;;  %519 = vmatpush.msra.mxu1 %v476_v61 }
  0xa8   :  { %500 = vmatpush.msra.mxu0 %v459_v54  ;;  %520 = vmatpush.msra.mxu1 %v475_v63 }
  0xaa   :  { %501 = vmatpush.msra.mxu0 %v458_v56  ;;  %521 = vmatpush.msra.mxu1 %v474_v1 }
  0xac   :  { %502 = vmatpush.msra.mxu0 %v457_v58  ;;  %522 = vmatpush.msra.mxu1 %v473_v2 }
  0xae   :  { %503 = vmatpush.msra.mxu0 %v456_v60  ;;  %523 = vmatpush.msra.mxu1 %v472_v3 }
  0xb0   :  { %504 = vmatpush.msra.mxu0 %v455_v62  ;;  %524 = vmatpush.msra.mxu1 %v471_v4 }
  0xb2   :  { %505 = vmatpush.msra.mxu0 %v454_v0  ;;  %525 = vmatpush.msra.mxu1 %v470_v5 }
 0x110   :  { %v309_v7 = vpop.f32.mrf.mxu0  ;;  %v329_v10 = vpop.f32.mrf.mxu1 }
 0x111   :  { %v310_v9 = vadd.f32 %v309_v7, %v288_v8 }
 0x113   :  { %v330_v11 = vadd.f32 %v329_v10, %v310_v9 }
 0x118   :  { %v389_v13 = vpop.f32.mrf.mxu0  ;;  %v409_v20 = vpop.f32.mrf.mxu1 }
 0x119   :  { %v390_v17 = vadd.f32 %v389_v13, %v289_v12 }
 0x11b   :  { %v410_v21 = vadd.f32 %v409_v20, %v390_v17 }
 0x120   :  { %v349_v14 = vpop.f32.mrf.mxu2  ;;  %v369_v15 = vpop.f32.mrf.mxu3 }
 0x121   :  { %v350_v16 = vadd.f32 %v349_v14, %v330_v11 }
 0x123   :  { %v370_v18 = vadd.f32 %v369_v15, %v350_v16 }
 0x125   :  { %v452_v19 = vmax.f32 %v370_v18, 0.0 }
 0x127   :  { %506 = vmatmul.f32.vlgmr.msra.gmra.mxu0 %v452_v19 }
 0x128   :  { %v429_v22 = vpop.f32.mrf.mxu2  ;;  %v449_v24 = vpop.f32.mrf.mxu3 }
 0x129   :  { %v430_v23 = vadd.f32 %v429_v22, %v410_v21 }
 0x12b   :  { %v450_v25 = vadd.f32 %v449_v24, %v430_v23 }
 0x12d   :  { %v453_v26 = vmax.f32 %v450_v25, 0.0 }
 0x12f   :  { %526 = vmatmul.f32.vlgmr.msra.gmra.mxu1 %v453_v26 }
 0x1a4   :  { %v507_v28 = vpop.f32.mrf.mxu0 }
 0x1a5   :  { %v508_v29 = vadd.f32 %v544_v27, %v507_v28 }
 0x1ac   :  { %v527_v30 = vpop.f32.mrf.mxu1 }
 0x1ad   :  { %v528_v31 = vadd.f32 %v527_v30, %v508_v29 }
 0x1af   :  { %v530_v32 = vmax.f32 %v528_v31, 0.0 }
 0x1b1   :  { %531 = vst [vmem:[%s1155_s7] sm:$0xff] %v530_v32 }

</bundles_post_ra>
